<compile_context>
chip_gen: v7x
topology: tpu7x:2x2x1
jax: 0.10.0
libtpu: 0.0.40
codegen_flags: <defaults>
</compile_context>

<pallas_src>
import jax
import jax.numpy as jnp
from jax.experimental import pallas as pl
from jax.experimental.pallas import tpu as pltpu


def _pointwise_conv_kernel(x_ref, w_ref, b_ref, o_ref):
    # x_ref: (1, Cin, M)   pixels on the lane axis (lane-dense)
    # w_ref: (Cout, Cin)   weight pre-scaled by 1/6
    # b_ref: (Cout, 1)     bias pre-scaled by 1/6
    # o_ref: (1, Cout, M)  output, pixels on lanes (lane-dense stores), already NCHW order
    x = x_ref[0, :, :]              # (Cin, M)
    w = w_ref[...]                  # (Cout, Cin)
    cin = x.shape[0]

    # y[co, m] = sum_c (w[co, c] / 6) * x[c, m]  -- unrolled VPU broadcast FMAs, no MXU.
    acc = w[:, 0:1] * x[0:1, :]
    for c in range(1, cin):
        acc = acc + w[:, c:c + 1] * x[c:c + 1, :]

    y = acc + b_ref[...]            # + bias/6  (lane broadcast of (Cout, 1))
    y = jnp.minimum(y, 6.0)         # clamp_max(6)
    y = jnp.maximum(y, 0.0)         # clamp_min(0)
    o_ref[0, :, :] = (y + 3.0).astype(o_ref.dtype)


def model_forward(x_nchw, weight, bias):
    """Conv2d(Cin, Cout, 1, stride=1, padding=1) -> /6 -> clamp[0,6] -> +3, NCHW in/out.

    x_nchw: (N, Cin, H, W) f32; weight: (Cout, Cin) (1x1 kernel squeezed); bias: (Cout,).
    Returns (N, Cout, H+2, W+2) f32, matching the PyTorch module.
    """
    N, Cin, H, W = x_nchw.shape
    Cout = weight.shape[0]
    pad = 1  # Conv2d padding=1 with a 1x1 kernel -> output spatial = H+2, W+2
    Hp, Wp = H + 2 * pad, W + 2 * pad
    M = Hp * Wp

    # Zero-pad spatial dims (cheap: only Cin=3 channels) and flatten pixels onto the lane axis.
    # No transposes: kernel output is already in NCHW order.
    x_pad = jnp.pad(x_nchw, ((0, 0), (0, 0), (pad, pad), (pad, pad)))
    x_flat = x_pad.reshape(N, Cin, M).astype(jnp.float32)

    # Fold the /6 into the parameters once (8x3 weight, 8-wide bias).
    w_scaled = (weight.astype(jnp.float32) / 6.0)                   # (Cout, Cin)
    b_scaled = (bias.astype(jnp.float32) / 6.0).reshape(Cout, 1)    # (Cout, 1)

    out_flat = pl.pallas_call(
        _pointwise_conv_kernel,
        out_shape=jax.ShapeDtypeStruct((N, Cout, M), jnp.float32),
        grid_spec=pltpu.PrefetchScalarGridSpec(
            num_scalar_prefetch=0,
            grid=(N,),  # one step per batch item; "parallel" -> both TCs used on v7x
            in_specs=[
                pl.BlockSpec((1, Cin, M), lambda n: (n, 0, 0)),
                pl.BlockSpec((Cout, Cin), lambda n: (0, 0)),  # constant index -> stays resident
                pl.BlockSpec((Cout, 1), lambda n: (0, 0)),
            ],
            out_specs=pl.BlockSpec((1, Cout, M), lambda n: (n, 0, 0)),
        ),
        compiler_params=pltpu.CompilerParams(
            dimension_semantics=("parallel",)),
    )(x_flat, w_scaled, b_scaled)

    # Free reshape: (N, Cout, Hp*Wp) -> (N, Cout, Hp, Wp), already NCHW.
    return out_flat.reshape(N, Cout, Hp, Wp)


if __name__ == "__main__":
    key = jax.random.PRNGKey(0)
    k_x, k_w, k_b = jax.random.split(key, 3)

    # Small shapes consistent with the module (Cin=3 fixed by Conv2d(3, 8, 1)).
    N, Cin, H, W = 2, 3, 16, 16
    Cout = 8

    x = jax.random.normal(k_x, (N, Cin, H, W), dtype=jnp.float32)
    # Deterministic synthetic parameters (Conv2d(3, 8, 1): weight (8,3,1,1) -> (8,3), bias (8,)).
    weight = 0.1 * jax.random.normal(k_w, (Cout, Cin), dtype=jnp.float32)
    bias = 0.1 * jax.random.normal(k_b, (Cout,), dtype=jnp.float32)

    out = model_forward(x, weight, bias)
    jax.block_until_ready(out)

    # Pure-JAX reference of the PyTorch module.
    x_pad = jnp.pad(x, ((0, 0), (0, 0), (1, 1), (1, 1)))
    ref = jnp.einsum("nchw,oc->nohw", x_pad, weight) + bias[None, :, None, None]
    ref = jnp.maximum(jnp.minimum(ref / 6.0, 6.0), 0.0) + 3.0

    assert out.shape == (N, Cout, H + 2, W + 2)
    assert jnp.max(jnp.abs(out - ref)) < 1e-4

    print("KERNEL_OK")
</pallas_src>

<mosaic_0001>
module attributes {stable_mosaic.version = 11 : i64} {
  func.func @_pointwise_conv_kernel(%arg0: i32, %arg1: memref<1x3x324xf32, #tpu.memory_space<vmem>>, %arg2: memref<8x3xf32, #tpu.memory_space<vmem>>, %arg3: memref<8x1xf32, #tpu.memory_space<vmem>>, %arg4: memref<1x8x324xf32, #tpu.memory_space<vmem>>) attributes {dimension_semantics = [#tpu.dimension_semantics<parallel>], iteration_bounds = array<i64: 2>, scalar_prefetch = 0 : i64, scratch_operands = 0 : i64, tpu.core_type = #tpu.core_type<tc>, window_params = [{transform_indices = @transform_0, window_bounds = array<i64: 1, 3, 324>}, {pipeline_mode = #tpu.pipeline_mode<synchronous>, transform_indices = @transform_1, window_bounds = array<i64: 8, 3>}, {pipeline_mode = #tpu.pipeline_mode<synchronous>, transform_indices = @transform_2, window_bounds = array<i64: 8, 1>}, {transform_indices = @transform_3, window_bounds = array<i64: 1, 8, 324>}]} {
    %c0 = arith.constant 0 : index
    %c0_0 = arith.constant 0 : index
    %c0_1 = arith.constant 0 : index
    %0 = vector.load %arg1[%c0, %c0_0, %c0_1] : memref<1x3x324xf32, #tpu.memory_space<vmem>>, vector<1x3x324xf32>
    %1 = vector.shape_cast %0 : vector<1x3x324xf32> to vector<3x324xf32>
    %c0_2 = arith.constant 0 : index
    %c0_3 = arith.constant 0 : index
    %2 = vector.load %arg2[%c0_2, %c0_3] : memref<8x3xf32, #tpu.memory_space<vmem>>, vector<8x3xf32>
    %3 = vector.extract_strided_slice %2 {offsets = [0, 0], sizes = [8, 1], strides = [1, 1]} : vector<8x3xf32> to vector<8x1xf32>
    %4 = vector.extract_strided_slice %1 {offsets = [0, 0], sizes = [1, 324], strides = [1, 1]} : vector<3x324xf32> to vector<1x324xf32>
    %5 = vector.broadcast %3 : vector<8x1xf32> to vector<8x324xf32>
    %6 = vector.broadcast %4 : vector<1x324xf32> to vector<8x324xf32>
    %7 = arith.mulf %5, %6 : vector<8x324xf32>
    %8 = vector.extract_strided_slice %2 {offsets = [0, 1], sizes = [8, 1], strides = [1, 1]} : vector<8x3xf32> to vector<8x1xf32>
    %9 = vector.extract_strided_slice %1 {offsets = [1, 0], sizes = [1, 324], strides = [1, 1]} : vector<3x324xf32> to vector<1x324xf32>
    %10 = vector.broadcast %8 : vector<8x1xf32> to vector<8x324xf32>
    %11 = vector.broadcast %9 : vector<1x324xf32> to vector<8x324xf32>
    %12 = arith.mulf %10, %11 : vector<8x324xf32>
    %13 = arith.addf %7, %12 : vector<8x324xf32>
    %14 = vector.extract_strided_slice %2 {offsets = [0, 2], sizes = [8, 1], strides = [1, 1]} : vector<8x3xf32> to vector<8x1xf32>
    %15 = vector.extract_strided_slice %1 {offsets = [2, 0], sizes = [1, 324], strides = [1, 1]} : vector<3x324xf32> to vector<1x324xf32>
    %16 = vector.broadcast %14 : vector<8x1xf32> to vector<8x324xf32>
    %17 = vector.broadcast %15 : vector<1x324xf32> to vector<8x324xf32>
    %18 = arith.mulf %16, %17 : vector<8x324xf32>
    %19 = arith.addf %13, %18 : vector<8x324xf32>
    %c0_4 = arith.constant 0 : index
    %c0_5 = arith.constant 0 : index
    %20 = vector.load %arg3[%c0_4, %c0_5] : memref<8x1xf32, #tpu.memory_space<vmem>>, vector<8x1xf32>
    %21 = vector.broadcast %20 : vector<8x1xf32> to vector<8x324xf32>
    %22 = arith.addf %19, %21 : vector<8x324xf32>
    %cst = arith.constant 6.000000e+00 : f32
    %23 = vector.broadcast %cst : f32 to vector<8x324xf32>
    %24 = arith.minimumf %22, %23 : vector<8x324xf32>
    %cst_6 = arith.constant 0.000000e+00 : f32
    %25 = vector.broadcast %cst_6 : f32 to vector<8x324xf32>
    %26 = arith.maximumf %24, %25 : vector<8x324xf32>
    %cst_7 = arith.constant 3.000000e+00 : f32
    %27 = vector.broadcast %cst_7 : f32 to vector<8x324xf32>
    %28 = arith.addf %26, %27 : vector<8x324xf32>
    %c0_8 = arith.constant 0 : index
    %c0_9 = arith.constant 0 : index
    %c0_10 = arith.constant 0 : index
    %29 = vector.load %arg4[%c0_8, %c0_9, %c0_10] : memref<1x8x324xf32, #tpu.memory_space<vmem>>, vector<1x8x324xf32>
    %30 = vector.shape_cast %29 : vector<1x8x324xf32> to vector<8x324xf32>
    %31 = vector.shape_cast %28 : vector<8x324xf32> to vector<1x8x324xf32>
    tpu.vector_store %arg4[%c0_8, %c0_9, %c0_10], %31 {strides = array<i32>} : memref<1x8x324xf32, #tpu.memory_space<vmem>>, vector<1x8x324xf32>,
    return
  }
  func.func @transform_0(%arg0: i32) -> (i32, i32, i32) {
    %c0_i32 = arith.constant 0 : i32
    %c0_i32_0 = arith.constant 0 : i32
    %c0_i32_1 = arith.constant 0 : i32
    return %arg0, %c0_i32, %c0_i32_0 : i32, i32, i32
  }
  func.func @transform_1(%arg0: i32) -> (i32, i32) {
    %c0_i32 = arith.constant 0 : i32
    %c0_i32_0 = arith.constant 0 : i32
    %c0_i32_1 = arith.constant 0 : i32
    return %c0_i32, %c0_i32_0 : i32, i32
  }
  func.func @transform_2(%arg0: i32) -> (i32, i32) {
    %c0_i32 = arith.constant 0 : i32
    %c0_i32_0 = arith.constant 0 : i32
    %c0_i32_1 = arith.constant 0 : i32
    return %c0_i32, %c0_i32_0 : i32, i32
  }
  func.func @transform_3(%arg0: i32) -> (i32, i32, i32) {
    %c0_i32 = arith.constant 0 : i32
    %c0_i32_0 = arith.constant 0 : i32
    %c0_i32_1 = arith.constant 0 : i32
    return %arg0, %c0_i32, %c0_i32_0 : i32, i32, i32
  }
}

</mosaic_0001>

<bundles_post_ra>
// kernel: tpu_custom_call.1
= control target key start
LH: loop header
LB: loop body
LE: loop exit
PB: predicated region body
PF: predicated region fallthrough
CT: control target
= control target key end

     0   :  { %8 = vsyncpa [#allocation3], 0  ;;  %s635_s0 = inlined_call_operand.vmem [shape: f32[2,3,324], index: 0, kind: input, shape index: {}]   ;;  %s636_s1 = inlined_call_operand.vmem [shape: f32[8,3], index: 1, kind: input, shape index: {}]   ;;  %s637_s2 = inlined_call_operand.vmem [shape: f32[8,1], index: 2, kind: input, shape index: {}]   ;;  %s638_s3 = inlined_call_operand.hbm [shape: f32[2,8,324], index: 3, kind: output, shape index: {}]  }
   0x1   :  { %10 = vsyncpa [#allocation3 + $0x1], 0  ;;  %s525_s12 = smov 0   ;;  %s527_s13 = smov 0  }
   0x2   :  { %s529_s14 = smov 0   ;;  %s531_s15 = smov 0  }
   0x3 LB: > { %s546_s16 = sadd.s32 4294967295, %s499_s15   ;;  %s379_s17 = sadd.s32 4294967294, %s499_s15   ;;  %s499_s15 = sphi %s531_s15, %s644_s15   ;;  %s495_s14 = sphi %s529_s14, %s643_s14   ;;  %s491_s13 = sphi %s527_s13, %s642_s13   ;;  %s487_s12 = sphi %s525_s12, %s641_s12  }
   0x4   : > { %s550_s18 = sadd.s32 1, %s499_s15   ;;  %s91_s19 = sadd.s32 1, %s495_s14 }
   0x5   : > { %s88_s20 = ssub.s32 %s499_s15, %s550_s18  ;;  %p101_p0 = scmp.ne.s32.totalorder %s495_s14, %s491_s13 }
   0x6   : > { %p89_p1 = scmp.eq.s32.totalorder %s88_s20, 0  ;;  %p102_p2 = scmp.eq.s32.totalorder %s546_s16, 1 }
   0x7   : > { %p107_p3 = scmp.ne.s32.totalorder %s491_s13, %s487_s12  ;;  %p108_p4 = scmp.eq.s32.totalorder %s379_s17, 1 }
   0x8   : > { %s561_s21 = scalar_select %p89_p1, %s495_s14, %s91_s19  }
   0x9   : > { %p563_p5 = por %p102_p2, %p101_p0  ;;  %p567_p6 = por %p108_p4, %p107_p3 }
   0xa   : > { %p382_p7 = scmp.ge.s32.totalorder %s499_s15, 1  ;;  %p140_p8 = scmp.lt.s32.totalorder %s499_s15, 3 }
   0xc   : > { %p141_p9 = pnand %p382_p7, %p140_p8 }
   0xd   : > { %v171_v0 = vld [vmem:[%s636_s1] sm:$0xff] (!%p141_p9)  ;;  %v501_v1 = vmov (!%p141_p9), 0   ;;  %v502_v2 = vmov (!%p141_p9), 2   ;;  %v503_v4 = vmov (!%p141_p9), 1   ;;  %p164_p10 = scmp.lt.s32.totalorder (!%p141_p9), %s546_s16, 1  ;;  %v179_v5 = vlaneseq (!%p141_p9)  ;;  %s161_s6 = sand.u32 (!%p141_p9), 1, %s491_s13  }
   0xe   : > { %144 = sbr.rel (%p141_p9) target bundleno = 177 (0xb1), region = 32  ;;  %432 = vset.pattern.permute.xlu0 (!%p141_p9), %v501_v1  ;;  %434 = vset.pattern.permute.xlu1 (!%p141_p9), %v502_v2  ;;  %v283_v3 = vld [vmem:[%s637_s2] sm:$0xff] (!%p141_p9)  ;;  %vm303_vm0 = vcmask (!%p141_p9), 556032   ;;  %s504_s24 = smov (!%p141_p9), [#allocation2]  }
   0xf   : > { %174 = vperm.xlu0 (!%p141_p9), %432, %v171_v0   ;;  %247 = vperm.xlu1 (!%p141_p9), %434, %v171_v0   ;;  %v180_v6 = vshrl.u32 (!%p141_p9), %v179_v5, 7  ;;  %s387_s7 = smul.u32 (!%p141_p9), 24, %s161_s6  ;;  %s441_s25 = sshll.u32 (!%p141_p9), %s504_s24, 4  ;;  %s442_s25 = int_to_ptr.vmem [resolvable:$false] %s441_s25 }
  0x10   : > { %s389_s8 = smul.u32 (!%p141_p9), 384, %s546_s16  ;;  %s443_s26 = scalar_lea.vmem (!%p141_p9), %s442_s25, 768 }
  0x11   : > { %v181_v7 = vsub.s32 (!%p141_p9), 0, %v180_v6  ;;  %v185_v8 = vsub.s32 (!%p141_p9), 4, %v180_v6  ;;  %v252_v10 = vsub.s32 (!%p141_p9), 2, %v180_v6  ;;  %v256_v11 = vsub.s32 (!%p141_p9), 6, %v180_v6  ;;  %s163_s9 = scalar_lea.vmem (!%p141_p9), [#allocation2], %s387_s7 }
  0x12   : > { %v215_v13 = vsub.s32 (!%p141_p9), 1, %v180_v6  ;;  %v219_v14 = vsub.s32 (!%p141_p9), 5, %v180_v6  ;;  %s320_s10 = sshll.u32 (!%p141_p9), %s163_s9, 4  ;;  %s591_s19 = scalar_lea.hbm (!%p141_p9), %s638_s3, %s389_s8  ;;  %s593_s10 = int_to_ptr.vmem [resolvable:$true] %s320_s10 }
  0x13   : > { %433 = vset.pattern.permute.xlu0 (!%p141_p9), %v503_v4  ;;  %435 = vset.pattern.permute.xlu1 (!%p141_p9), %v501_v1  ;;  %s437_s20 = scalar_lea.vmem (!%p141_p9), %s593_s10, 384  ;;  %p444_p0 = scmp.lt.s32.totalorder (!%p141_p9), %s593_s10, %s442_s25 }
  0x14   : > { %210 = vperm.xlu0 (!%p141_p9), %433, %v171_v0   ;;  %286 = vperm.xlu1 (!%p141_p9), %435, %v283_v3   ;;  %p438_p11 = scmp.ne.s32.totalorder (!%p141_p9), %s593_s10, %s437_s20  ;;  %p445_p1 = scmp.lt.s32.totalorder (!%p141_p9), %s443_s26, %s437_s20 }
  0x15   : > { %s165_s28 = scalar_select %p164_p10, %s546_s16, 1 }
  0x16   : > { %s306_s16 = scalar_lea.sflag [#allocation3], %s161_s6  ;;  %p439_p12 = pnand %p438_p11, %p563_p5 }
  0x17   : > { %s388_s29 = smul.u32 12, %s165_s28  ;;  %p446_p2 = por %p445_p1, %p444_p0 }
  0x18   : > { %436 = vset.pattern.permute.xlu0 %v501_v1  ;;  %p440_p13 = pneg %p439_p12 }
  0x19   : > { %s168_s5 = scalar_lea.vmem %s635_s0, %s388_s29 }
  0x1a   : > { %v169_v9 = vld [vmem:[%s168_s5] sm:$0x77]  ;;  %v170_v12 = vld [vmem:[%s168_s5 + $0x8] sm:$0x7]  ;;  %p447_p3 = pnand %p446_p2, %p440_p13 }
  0x1b   : > { %v182_v15 = vrot.slane %v169_v9, %v181_v7  ;;  %v186_v16 = vrot.slane %v169_v9, %v185_v8  ;;  %v190_v17 = vrot.slane %v170_v12, %v181_v7  ;;  %v253_v18 = vrot.slane %v169_v9, %v252_v10 }
  0x1c   : > { %v257_v19 = vrot.slane %v169_v9, %v256_v11  ;;  %v216_v20 = vrot.slane %v169_v9, %v215_v13  ;;  %v220_v21 = vrot.slane %v169_v9, %v219_v14  ;;  %v224_v22 = vrot.slane %v170_v12, %v215_v13 }
  0x1d   : > { %v261_v23 = vrot.slane %v170_v12, %v252_v10  ;;  %v197_v25 = vrot.slane %v182_v15, %v181_v7  ;;  %v201_v26 = vrot.slane %v186_v16, %v181_v7  ;;  %v205_v27 = vrot.slane %v190_v17, %v181_v7 }
  0x1e   : > { %v268_v28 = vrot.slane %v253_v18, %v252_v10  ;;  %v272_v29 = vrot.slane %v257_v19, %v252_v10  ;;  %v231_v30 = vrot.slane %v216_v20, %v215_v13  ;;  %v235_v31 = vrot.slane %v220_v21, %v215_v13 }
  0x1f   : > { %v239_v32 = vrot.slane %v224_v22, %v215_v13  ;;  %v276_v34 = vrot.slane %v261_v23, %v252_v10 }
  0x8e   : > { %v175_v24 = vpop.permute.xlu0 %174  ;;  %v248_v33 = vpop.permute.xlu1 %247 }
  0x8f   : > { %v206_v35 = vmul.f32 %v197_v25, %v175_v24  ;;  %v207_v36 = vmul.f32 %v201_v26, %v175_v24  ;;  %v208_v37 = vmul.f32 %v205_v27, %v175_v24  ;;  %v277_v39 = vmul.f32 %v268_v28, %v248_v33 }
  0x90   : > { %v278_v40 = vmul.f32 %v272_v29, %v248_v33  ;;  %v279_v44 = vmul.f32 %v276_v34, %v248_v33 }
  0x93   : > { %v211_v38 = vpop.permute.xlu0 %210  ;;  %v287_v48 = vpop.permute.xlu1 %286 }
  0x94   : > { %v240_v41 = vmul.f32 %v231_v30, %v211_v38  ;;  %v241_v42 = vmul.f32 %v235_v31, %v211_v38  ;;  %v242_v43 = vmul.f32 %v239_v32, %v211_v38 }
  0x96   : > { %v243_v45 = vadd.f32 %v240_v41, %v206_v35  ;;  %v244_v46 = vadd.f32 %v241_v42, %v207_v36  ;;  %v245_v47 = vadd.f32 %v242_v43, %v208_v37 }
  0x98   : > { %v280_v49 = vadd.f32 %v277_v39, %v243_v45  ;;  %v281_v50 = vadd.f32 %v278_v40, %v244_v46  ;;  %v282_v51 = vadd.f32 %v279_v44, %v245_v47 }
  0x9a   : > { %v289_v52 = vadd.f32 %v287_v48, %v280_v49  ;;  %v290_v53 = vadd.f32 %v287_v48, %v281_v50  ;;  %v291_v54 = vadd.f32 %v287_v48, %v282_v51 }
  0x9c   : > { %v292_v55 = vmin.f32 %v289_v52, 6.0  ;;  %v293_v56 = vmin.f32 %v290_v53, 6.0  ;;  %v294_v57 = vmin.f32 %v291_v54, 6.0 }
  0x9e   : > { %v295_v58 = vmax.f32 %v292_v55, 0.0  ;;  %v296_v59 = vmax.f32 %v293_v56, 0.0  ;;  %v297_v60 = vmax.f32 %v294_v57, 0.0 }
  0xa0   : > { %v298_v61 = vadd.f32 3.0, %v295_v58  ;;  %v299_v62 = vadd.f32 3.0, %v296_v59  ;;  %v300_v63 = vadd.f32 3.0, %v297_v60 }
  0xa2   : > { %301 = vst [vmem:[%s163_s9] sm:$0xff] %v298_v61  ;;  %302 = vst [vmem:[%s163_s9 + $0x8] sm:$0xff] %v299_v62 }
  0xa3   : > { %304 = vst.msk [vmem:[%s163_s9 + $0x10] sm:$0xff] %vm303_vm0, %v300_v63 }
  0xa4   : > { %450 = shalt.err (!%p447_p3)
}
  0xa5   : > { %s451_s27 = scalar_lea.hbm %s591_s19, 384  ;;  %s455_s30 = scalar_lea.hbm %s638_s3, 768 }
  0xa6   : > { %p452_p4 = scmp.ne.s32.totalorder %s591_s19, %s451_s27  ;;  %p456_p9 = scmp.lt.u32.totalorder %s591_s19, %s638_s3 }
  0xa7   : > { %p457_p10 = scmp.lt.u32.totalorder %s455_s30, %s451_s27  ;;  %p459_p12 = scmp.lt.u32.totalorder %s451_s27, %s591_s19 }
  0xa8   : > { %p453_p7 = pnand %p452_p4, %p563_p5 }
  0xa9   : > { %p458_p11 = por %p457_p10, %p456_p9 }
  0xaa   : > { %p454_p8 = pneg %p453_p7 }
  0xab   : > { %p460_p13 = por %p459_p12, %p458_p11 }
  0xad   : > { %p461_p0 = pnand %p460_p13, %p454_p8 }
  0xaf   : > { %464 = shalt.err (!%p461_p0)
}
  0xb0   : > { %390 = dma.vmem_to_hbm [thread:$0]  (%p563_p5), %s593_s10, 384, %s591_s19, %s306_s16  }
  0xb1 PF: > { %p396_p1 = scmp.ge.s32.totalorder %s499_s15, 2  ;;  %s332_s6 = sand.u32 1, %s487_s12  }
  0xb2   : > { %s333_s7 = scalar_lea.sflag [#allocation3], %s332_s6 }
  0xb3   : > { %p393_p2 = pnand %p396_p1, %p567_p6 }
  0xb5   : > { %482 = dma.done.wait (!%p393_p2), %s333_s7, 384  }
  0xb6   : > { %484 = vsyncadd (!%p393_p2), %s333_s7, 4294966912  ;;  %p13_p3 = scmp.ge.s32.totalorder %s550_s18, 4   ;;  %s641_s12 = smov %s491_s13 }
  0xb7   : > { %s642_s13 = smov %s495_s14  ;;  %s643_s14 = smov %s561_s21 }
  0xb8   : > { %s644_s15 = smov %s550_s18  ;;  %15 = sbr.rel (!%p13_p3) target bundleno = 3 (0x3), region = 67 }
  0xbf   :  { %338 = vsyncpa [#allocation3], 1 }
  0xc0   :  { %340 = vsyncpa [#allocation3 + $0x1], 1 }

</bundles_post_ra>
